<compile_context>
chip_gen: v5e
topology: v5e:2x2
jax: 0.10.0
libtpu: 0.0.40
codegen_flags: <defaults>
</compile_context>

<pallas_src>
import functools

import jax
import jax.numpy as jnp
from jax.experimental import pallas as pl
from jax.experimental.pallas import tpu as pltpu


def _cdan_kernel(feat_ref, smax_ref, w1_ref, w2_ref, b1_ref, b2_ref,
                 w3_ref, b3_ref, out_ref, acc_ref, ssum_ref,
                 *, block_c, d_total):
    """Grid = (batch tiles, class tiles of the D = C*F reduction).

    feat_ref : (tb, F)   f32      smax_ref : (tb, tc) f32 (classes of tile k)
    w1_ref   : (tc*F, Hp)          w2_ref   : (Hp, Hp)   (compute dtype)
    b1/b2/w3 : (1, Hp)   f32       b3_ref   : (1, 1) f32 in SMEM
    out_ref  : (tb, 1)   f32
    acc_ref  : (tb, Hp)  f32 scratch (un-normalized x @ w1 accumulator)
    ssum_ref : (tb, 1)   f32 scratch (running sum_c |softmax_c|)
    """
    k = pl.program_id(1)
    nk = pl.num_programs(1)

    @pl.when(k == 0)
    def _init():
        acc_ref[...] = jnp.zeros_like(acc_ref)
        ssum_ref[...] = jnp.zeros_like(ssum_ref)

    feat = feat_ref[...]                        # (tb, F) f32
    fabs = jnp.abs(feat)                        # (tb, F)
    s_abs = jnp.abs(smax_ref[...])              # (tb, tc); |s*f| = |s|*|f|
    cdt = w1_ref.dtype                          # matmul compute dtype (f32/bf16)

    # Fused class tile: build the (tb, tc*F) outer-product slab in vregs
    # (pure lane placement when F % 128 == 0) and push ONE K = tc*F matmul.
    x_slab = jnp.concatenate(
        [jnp.sqrt(s_abs[:, c:c + 1] * fabs + 1e-12) for c in range(block_c)],
        axis=-1)                                # (tb, tc*F) f32 prologue
    acc_ref[...] += jnp.dot(x_slab.astype(cdt), w1_ref[...],
                            preferred_element_type=jnp.float32)
    ssum_ref[...] += jnp.sum(s_abs, axis=-1, keepdims=True)

    @pl.when(k == nk - 1)
    def _finalize():
        # Closed-form row norm of sqrt(|adv| + eps):
        #   ||x||^2 = sum_d (|adv_d| + eps) = (sum_c |s_c|)(sum_f |f_f|) + D*eps
        fsum = jnp.sum(fabs, axis=-1, keepdims=True)                 # (tb, 1)
        norm2 = ssum_ref[...] * fsum + jnp.float32(d_total * 1e-12)
        rnorm = jax.lax.rsqrt(jnp.maximum(norm2, 1e-24))             # EUP
        # matmul is linear in a per-row scale -> normalize the accumulator.
        # GRL = identity in forward; Dropout = identity (eval mode).
        h1 = jnp.maximum(acc_ref[...] * rnorm + b1_ref[...], 0.0)    # (tb, Hp)
        h2 = jnp.dot(h1.astype(w2_ref.dtype), w2_ref[...],
                     preferred_element_type=jnp.float32) + b2_ref[...]
        h2 = jnp.maximum(h2, 0.0)
        # Linear(H, 1) as VPU multiply + lane reduction (skip an N=1 MXU matmul)
        logits = jnp.sum(h2 * w3_ref[...], axis=-1, keepdims=True) + b3_ref[0, 0]
        out_ref[...] = jax.nn.sigmoid(logits).astype(out_ref.dtype)


def _default_vmem_budget():
    """VMEM byte budget for tile selection (safe fallback for v7x's 64 MiB)."""
    try:
        cap = getattr(pltpu.get_tpu_info(), "vmem_capacity_bytes", None)
        if cap:
            return int(cap * 0.70)
    except Exception:
        pass
    return 48 * 1024 * 1024


def _vmem_estimate(block_b, block_c, F, H_pad, w_bytes):
    w1_stream = 2 * block_c * F * H_pad * w_bytes        # double-buffered w1 tile
    w2_res = 2 * H_pad * H_pad * w_bytes                 # w2 (2 pipeline buffers)
    acc = block_b * H_pad * 4 + block_b * 128 * 4        # acc + ssum scratch
    x_slab = block_b * block_c * F * 4                   # slab built in VMEM/vregs
    feat = 2 * block_b * max(F, 128) * 4
    smax = 2 * block_b * 128 * 4                         # lane-padded class tile
    small = 8 * 2 * H_pad * 4 + (1 << 16)
    return w1_stream + w2_res + acc + x_slab + feat + smax + small


def cdan_discriminator_forward(features, softmax_outputs, params, *,
                               block_b=None, block_c=None,
                               compute_dtype=jnp.bfloat16,
                               vmem_budget_bytes=None):
    """features: (B, F) f32, softmax_outputs: (B, C) f32 -> (B, 1) f32.

    compute_dtype=jnp.float32 is the bit-faithful path; bf16 (default) halves
    the dominant w1/w2 HBM traffic while keeping f32 accumulation and an f32
    elementwise prologue.
    """
    B, F = features.shape
    B2, C = softmax_outputs.shape
    assert B == B2
    w1, b1, w2, b2, w3, b3 = params
    D, H = w1.shape
    assert D == C * F, "w1 must be (C*F, H) with class-major flattening"

    w_bytes = jnp.dtype(compute_dtype).itemsize
    budget = vmem_budget_bytes or _default_vmem_budget()

    # --- tile selection ------------------------------------------------------
    if block_b is None:
        # Full batch if reasonable (amortizes the re-streamed w1), else the
        # largest divisor of B among common tile sizes.
        if B <= 512:
            block_b = B
        else:
            block_b = next((b for b in (512, 384, 256, 128, 64, 32, 16, 8)
                            if B % b == 0), B)
    H_pad = pl.cdiv(H, 128) * 128
    if block_c is None:
        cands = [c for c in range(C, 0, -1)
                 if C % c == 0 and ((c * F) % 8 == 0 or c == C)]
        block_c = cands[-1]
        for c in cands:
            if _vmem_estimate(block_b, c, F, H_pad, w_bytes) <= budget:
                block_c = c
                break

    assert B % block_b == 0 and (block_b % 8 == 0 or block_b == B)
    assert C % block_c == 0 and ((block_c * F) % 8 == 0 or block_c == C)
    nb = B // block_b
    nk = C // block_c

    # --- operand preparation -------------------------------------------------
    # Pad H to a lane multiple (zeros are mathematically inert end-to-end).
    if H_pad != H:
        w1 = jnp.pad(w1, ((0, 0), (0, H_pad - H)))
        w2 = jnp.pad(w2, ((0, H_pad - H), (0, H_pad - H)))
        b1 = jnp.pad(b1, (0, H_pad - H))
        b2 = jnp.pad(b2, (0, H_pad - H))
        w3 = jnp.pad(w3, (0, H_pad - H))

    # w1 stays flat class-major (row c*F + f), streamed in the compute dtype.
    w1_c = w1.astype(compute_dtype)                       # (C*F, Hp)
    w2_c = w2.astype(compute_dtype)                       # (Hp, Hp)
    b1_r = b1.reshape(1, H_pad).astype(jnp.float32)
    b2_r = b2.reshape(1, H_pad).astype(jnp.float32)
    w3_r = w3.reshape(1, H_pad).astype(jnp.float32)
    b3_r = b3.reshape(1, 1).astype(jnp.float32)

    # Pre-tile softmax to (nk, B, block_c): tile k holds classes
    # [k*block_c, (k+1)*block_c) in its (contiguous, dense) last dim.
    smax_tiled = (softmax_outputs.astype(jnp.float32)
                  .reshape(B, nk, block_c).transpose(1, 0, 2))

    kernel = functools.partial(_cdan_kernel, block_c=block_c, d_total=D)

    grid_spec = pltpu.PrefetchScalarGridSpec(
        num_scalar_prefetch=0,
        grid=(nb, nk),                                            # reduction last
        in_specs=[
            pl.BlockSpec((block_b, F), lambda bi, k: (bi, 0)),        # features
            pl.BlockSpec((None, block_b, block_c),
                         lambda bi, k: (k, bi, 0)),                   # softmax tile
            pl.BlockSpec((block_c * F, H_pad), lambda bi, k: (k, 0)), # w1 (stream)
            pl.BlockSpec((H_pad, H_pad), lambda bi, k: (0, 0)),       # w2 (resident)
            pl.BlockSpec((1, H_pad), lambda bi, k: (0, 0)),           # b1
            pl.BlockSpec((1, H_pad), lambda bi, k: (0, 0)),           # b2
            pl.BlockSpec((1, H_pad), lambda bi, k: (0, 0)),           # w3 row
            pl.BlockSpec(memory_space=pltpu.MemorySpace.SMEM),        # b3 scalar
        ],
        out_specs=pl.BlockSpec((block_b, 1), lambda bi, k: (bi, 0)),
        scratch_shapes=[
            pltpu.VMEM((block_b, H_pad), jnp.float32),   # x @ w1 accumulator
            pltpu.VMEM((block_b, 1), jnp.float32),       # running sum_c |softmax|
        ],
    )

    # v7x: with nb <= 2, megacore-sharding the batch axis would re-stream the
    # dominant w1 traffic on both TCs — keep it "arbitrary" in that case.
    batch_sem = "parallel" if nb > 2 else "arbitrary"
    vmem_limit = int(min(budget * 1.25, 128 * 1024 * 1024))

    return pl.pallas_call(
        kernel,
        out_shape=jax.ShapeDtypeStruct((B, 1), jnp.float32),
        grid_spec=grid_spec,
        compiler_params=pltpu.CompilerParams(
            dimension_semantics=(batch_sem, "arbitrary"),
            vmem_limit_bytes=vmem_limit),
    )(features.astype(jnp.float32), smax_tiled, w1_c, w2_c,
      b1_r, b2_r, w3_r, b3_r)


def init_params(key, feature_dim, hidden_dim):
    """Matches the module's init (weights ~ N(0, std), biases 0), stored in
    'x @ W' (in, out) layout."""
    k1, k2, k3 = jax.random.split(key, 3)
    w1 = 0.01 * jax.random.normal(k1, (feature_dim, hidden_dim), jnp.float32)
    w2 = 0.01 * jax.random.normal(k2, (hidden_dim, hidden_dim), jnp.float32)
    w3 = 0.3 * jax.random.normal(k3, (hidden_dim,), jnp.float32)
    b1 = jnp.zeros((hidden_dim,), jnp.float32)
    b2 = jnp.zeros((hidden_dim,), jnp.float32)
    b3 = jnp.zeros((), jnp.float32)
    return (w1, b1, w2, b2, w3, b3)


def reference_forward(features, softmax_outputs, params):
    """Pure-JAX f32 reference mirroring the PyTorch forward (eval mode)."""
    w1, b1, w2, b2, w3, b3 = params
    B, F = features.shape
    C = softmax_outputs.shape[1]
    adv = (softmax_outputs[:, :, None] * features[:, None, :]).reshape(B, C * F)
    adv = jnp.sqrt(jnp.abs(adv) + 1e-12)
    norm = jnp.sqrt(jnp.sum(adv * adv, axis=1, keepdims=True))
    adv = adv / jnp.maximum(norm, 1e-12)
    h1 = jnp.maximum(adv @ w1 + b1.reshape(1, -1), 0.0)
    h2 = jnp.maximum(h1 @ w2 + b2.reshape(1, -1), 0.0)
    return jax.nn.sigmoid(h2 @ w3.reshape(-1, 1) + b3.reshape(1, 1))


if __name__ == "__main__":
    # Small shapes: batch=16, backbone feature dim=16, num classes=16,
    # hidden=64 => ad_layer1 input (feature_dim in __init__) = 16*16 = 256.
    B, F, C, H = 16, 16, 16, 64
    D = C * F

    key = jax.random.PRNGKey(0)
    kf, ks, kp = jax.random.split(key, 3)
    features = jax.random.normal(kf, (B, F), jnp.float32)
    softmax_outputs = jax.nn.softmax(
        jax.random.normal(ks, (B, C), jnp.float32), axis=-1)
    params = init_params(kp, D, H)

    ref = reference_forward(features, softmax_outputs, params)

    # f32 path (bit-faithful to the PyTorch module); grid = (2 batch, 2 class).
    out_f32 = cdan_discriminator_forward(
        features, softmax_outputs, params,
        block_b=8, block_c=8, compute_dtype=jnp.float32)
    out_f32 = jax.block_until_ready(out_f32)
    assert out_f32.shape == (B, 1)
    assert jnp.allclose(out_f32, ref, atol=1e-5, rtol=1e-5), (out_f32, ref)

    # Default path: bf16 weight streaming, auto tile selection (grid (1, 1)).
    out_auto = cdan_discriminator_forward(features, softmax_outputs, params)
    out_auto = jax.block_until_ready(out_auto)
    assert jnp.allclose(out_auto, ref, atol=2e-2, rtol=2e-2), (out_auto, ref)

    # bf16 weight streaming with an explicit (2, 2) grid.
    out_bf16 = cdan_discriminator_forward(
        features, softmax_outputs, params,
        block_b=8, block_c=8, compute_dtype=jnp.bfloat16)
    out_bf16 = jax.block_until_ready(out_bf16)
    assert jnp.allclose(out_bf16, ref, atol=2e-2, rtol=2e-2), (out_bf16, ref)

    print("KERNEL_OK")
</pallas_src>

<mosaic_0001>
module attributes {stable_mosaic.version = 11 : i64} {
  func.func @_cdan_kernel(%arg0: i32, %arg1: i32, %arg2: memref<8x16xf32, #tpu.memory_space<vmem>>, %arg3: memref<1x8x8xf32, #tpu.memory_space<vmem>>, %arg4: memref<128x128xf32, #tpu.memory_space<vmem>>, %arg5: memref<128x128xf32, #tpu.memory_space<vmem>>, %arg6: memref<1x128xf32, #tpu.memory_space<vmem>>, %arg7: memref<1x128xf32, #tpu.memory_space<vmem>>, %arg8: memref<1x128xf32, #tpu.memory_space<vmem>>, %arg9: memref<1x1xf32, #tpu.memory_space<smem>>, %arg10: memref<8x1xf32, #tpu.memory_space<vmem>>, %arg11: memref<8x128xf32, #tpu.memory_space<vmem>>, %arg12: memref<8x1xf32, #tpu.memory_space<vmem>>) attributes {dimension_semantics = [#tpu.dimension_semantics<arbitrary>, #tpu.dimension_semantics<arbitrary>], iteration_bounds = array<i64: 2, 2>, scalar_prefetch = 0 : i64, scratch_operands = 2 : i64, tpu.core_type = #tpu.core_type<tc>, window_params = [{transform_indices = @transform_0, window_bounds = array<i64: 8, 16>}, {transform_indices = @transform_1, window_bounds = array<i64: 1, 8, 8>}, {transform_indices = @transform_2, window_bounds = array<i64: 128, 128>}, {pipeline_mode = #tpu.pipeline_mode<synchronous>, transform_indices = @transform_3, window_bounds = array<i64: 128, 128>}, {pipeline_mode = #tpu.pipeline_mode<synchronous>, transform_indices = @transform_4, window_bounds = array<i64: 1, 128>}, {pipeline_mode = #tpu.pipeline_mode<synchronous>, transform_indices = @transform_5, window_bounds = array<i64: 1, 128>}, {pipeline_mode = #tpu.pipeline_mode<synchronous>, transform_indices = @transform_6, window_bounds = array<i64: 1, 128>}, {transform_indices = @transform_7, window_bounds = array<i64: 1, 1>}, {transform_indices = @transform_8, window_bounds = array<i64: 8, 1>}]} {
    %c0_i32 = arith.constant 0 : i32
    %0 = arith.cmpi eq, %arg1, %c0_i32 : i32
    %1 = arith.extui %0 : i1 to i32
    %c0_i32_0 = arith.constant 0 : i32
    %2 = arith.cmpi ne, %1, %c0_i32_0 : i32
    scf.if %2 {
      %cst_25 = arith.constant 0.000000e+00 : f32
      %70 = vector.broadcast %cst_25 : f32 to vector<8x128xf32>
      %c0_26 = arith.constant 0 : index
      %c0_27 = arith.constant 0 : index
      %71 = vector.load %arg11[%c0_26, %c0_27] : memref<8x128xf32, #tpu.memory_space<vmem>>, vector<8x128xf32>
      tpu.vector_store %arg11[%c0_26, %c0_27], %70 {strides = array<i32>} : memref<8x128xf32, #tpu.memory_space<vmem>>, vector<8x128xf32>,
      %cst_28 = arith.constant 0.000000e+00 : f32
      %72 = vector.broadcast %cst_28 : f32 to vector<8x1xf32>
      %c0_29 = arith.constant 0 : index
      %c0_30 = arith.constant 0 : index
      %73 = vector.load %arg12[%c0_29, %c0_30] : memref<8x1xf32, #tpu.memory_space<vmem>>, vector<8x1xf32>
      tpu.vector_store %arg12[%c0_29, %c0_30], %72 {strides = array<i32>} : memref<8x1xf32, #tpu.memory_space<vmem>>, vector<8x1xf32>,
    } else {
    }
    %c0 = arith.constant 0 : index
    %c0_1 = arith.constant 0 : index
    %3 = vector.load %arg2[%c0, %c0_1] : memref<8x16xf32, #tpu.memory_space<vmem>>, vector<8x16xf32>
    %4 = math.absf %3 : vector<8x16xf32>
    %c0_2 = arith.constant 0 : index
    %c0_3 = arith.constant 0 : index
    %c0_4 = arith.constant 0 : index
    %5 = vector.load %arg3[%c0_2, %c0_3, %c0_4] : memref<1x8x8xf32, #tpu.memory_space<vmem>>, vector<1x8x8xf32>
    %6 = vector.shape_cast %5 : vector<1x8x8xf32> to vector<8x8xf32>
    %7 = math.absf %6 : vector<8x8xf32>
    %8 = vector.extract_strided_slice %7 {offsets = [0, 0], sizes = [8, 1], strides = [1, 1]} : vector<8x8xf32> to vector<8x1xf32>
    %9 = vector.broadcast %8 : vector<8x1xf32> to vector<8x16xf32>
    %10 = arith.mulf %9, %4 : vector<8x16xf32>
    %cst = arith.constant 9.99999996E-13 : f32
    %11 = vector.broadcast %cst : f32 to vector<8x16xf32>
    %12 = arith.addf %10, %11 : vector<8x16xf32>
    %13 = math.sqrt %12 : vector<8x16xf32>
    %14 = vector.extract_strided_slice %7 {offsets = [0, 1], sizes = [8, 1], strides = [1, 1]} : vector<8x8xf32> to vector<8x1xf32>
    %15 = vector.broadcast %14 : vector<8x1xf32> to vector<8x16xf32>
    %16 = arith.mulf %15, %4 : vector<8x16xf32>
    %cst_5 = arith.constant 9.99999996E-13 : f32
    %17 = vector.broadcast %cst_5 : f32 to vector<8x16xf32>
    %18 = arith.addf %16, %17 : vector<8x16xf32>
    %19 = math.sqrt %18 : vector<8x16xf32>
    %20 = vector.extract_strided_slice %7 {offsets = [0, 2], sizes = [8, 1], strides = [1, 1]} : vector<8x8xf32> to vector<8x1xf32>
    %21 = vector.broadcast %20 : vector<8x1xf32> to vector<8x16xf32>
    %22 = arith.mulf %21, %4 : vector<8x16xf32>
    %cst_6 = arith.constant 9.99999996E-13 : f32
    %23 = vector.broadcast %cst_6 : f32 to vector<8x16xf32>
    %24 = arith.addf %22, %23 : vector<8x16xf32>
    %25 = math.sqrt %24 : vector<8x16xf32>
    %26 = vector.extract_strided_slice %7 {offsets = [0, 3], sizes = [8, 1], strides = [1, 1]} : vector<8x8xf32> to vector<8x1xf32>
    %27 = vector.broadcast %26 : vector<8x1xf32> to vector<8x16xf32>
    %28 = arith.mulf %27, %4 : vector<8x16xf32>
    %cst_7 = arith.constant 9.99999996E-13 : f32
    %29 = vector.broadcast %cst_7 : f32 to vector<8x16xf32>
    %30 = arith.addf %28, %29 : vector<8x16xf32>
    %31 = math.sqrt %30 : vector<8x16xf32>
    %32 = vector.extract_strided_slice %7 {offsets = [0, 4], sizes = [8, 1], strides = [1, 1]} : vector<8x8xf32> to vector<8x1xf32>
    %33 = vector.broadcast %32 : vector<8x1xf32> to vector<8x16xf32>
    %34 = arith.mulf %33, %4 : vector<8x16xf32>
    %cst_8 = arith.constant 9.99999996E-13 : f32
    %35 = vector.broadcast %cst_8 : f32 to vector<8x16xf32>
    %36 = arith.addf %34, %35 : vector<8x16xf32>
    %37 = math.sqrt %36 : vector<8x16xf32>
    %38 = vector.extract_strided_slice %7 {offsets = [0, 5], sizes = [8, 1], strides = [1, 1]} : vector<8x8xf32> to vector<8x1xf32>
    %39 = vector.broadcast %38 : vector<8x1xf32> to vector<8x16xf32>
    %40 = arith.mulf %39, %4 : vector<8x16xf32>
    %cst_9 = arith.constant 9.99999996E-13 : f32
    %41 = vector.broadcast %cst_9 : f32 to vector<8x16xf32>
    %42 = arith.addf %40, %41 : vector<8x16xf32>
    %43 = math.sqrt %42 : vector<8x16xf32>
    %44 = vector.extract_strided_slice %7 {offsets = [0, 6], sizes = [8, 1], strides = [1, 1]} : vector<8x8xf32> to vector<8x1xf32>
    %45 = vector.broadcast %44 : vector<8x1xf32> to vector<8x16xf32>
    %46 = arith.mulf %45, %4 : vector<8x16xf32>
    %cst_10 = arith.constant 9.99999996E-13 : f32
    %47 = vector.broadcast %cst_10 : f32 to vector<8x16xf32>
    %48 = arith.addf %46, %47 : vector<8x16xf32>
    %49 = math.sqrt %48 : vector<8x16xf32>
    %50 = vector.extract_strided_slice %7 {offsets = [0, 7], sizes = [8, 1], strides = [1, 1]} : vector<8x8xf32> to vector<8x1xf32>
    %51 = vector.broadcast %50 : vector<8x1xf32> to vector<8x16xf32>
    %52 = arith.mulf %51, %4 : vector<8x16xf32>
    %cst_11 = arith.constant 9.99999996E-13 : f32
    %53 = vector.broadcast %cst_11 : f32 to vector<8x16xf32>
    %54 = arith.addf %52, %53 : vector<8x16xf32>
    %55 = math.sqrt %54 : vector<8x16xf32>
    %56 = tpu.concatenate %13, %19, %25, %31, %37, %43, %49, %55 in 1 : vector<8x16xf32>, vector<8x16xf32>, vector<8x16xf32>, vector<8x16xf32>, vector<8x16xf32>, vector<8x16xf32>, vector<8x16xf32>, vector<8x16xf32> -> vector<8x128xf32>
    %c0_12 = arith.constant 0 : index
    %c0_13 = arith.constant 0 : index
    %57 = vector.load %arg11[%c0_12, %c0_13] : memref<8x128xf32, #tpu.memory_space<vmem>>, vector<8x128xf32>
    %c0_14 = arith.constant 0 : index
    %c0_15 = arith.constant 0 : index
    %58 = vector.load %arg4[%c0_14, %c0_15] : memref<128x128xf32, #tpu.memory_space<vmem>>, vector<128x128xf32>
    %cst_16 = arith.constant dense<0.000000e+00> : vector<8x128xf32>
    %59 = tpu.matmul %56, %58, %cst_16 {dimension_numbers = #tpu.dot_dimension_numbers<[1], [0], [0], [1], [0, 0, 1, 1], [], []>} : vector<8x128xf32>, vector<128x128xf32>, vector<8x128xf32> -> vector<8x128xf32>
    %60 = arith.addf %57, %59 : vector<8x128xf32>
    %c0_17 = arith.constant 0 : index
    %c0_18 = arith.constant 0 : index
    %61 = vector.load %arg11[%c0_17, %c0_18] : memref<8x128xf32, #tpu.memory_space<vmem>>, vector<8x128xf32>
    tpu.vector_store %arg11[%c0_17, %c0_18], %60 {strides = array<i32>} : memref<8x128xf32, #tpu.memory_space<vmem>>, vector<8x128xf32>,
    %c0_19 = arith.constant 0 : index
    %c0_20 = arith.constant 0 : index
    %62 = vector.load %arg12[%c0_19, %c0_20] : memref<8x1xf32, #tpu.memory_space<vmem>>, vector<8x1xf32>
    %cst_21 = arith.constant dense<0.000000e+00> : vector<8xf32>
    %63 = vector.multi_reduction <add>, %7, %cst_21 [1] : vector<8x8xf32> to vector<8xf32>
    %64 = vector.shape_cast %63 : vector<8xf32> to vector<8x1xf32>
    %65 = arith.addf %62, %64 : vector<8x1xf32>
    %c0_22 = arith.constant 0 : index
    %c0_23 = arith.constant 0 : index
    %66 = vector.load %arg12[%c0_22, %c0_23] : memref<8x1xf32, #tpu.memory_space<vmem>>, vector<8x1xf32>
    tpu.vector_store %arg12[%c0_22, %c0_23], %65 {strides = array<i32>} : memref<8x1xf32, #tpu.memory_space<vmem>>, vector<8x1xf32>,
    %c1_i32 = arith.constant 1 : i32
    %67 = arith.cmpi eq, %arg1, %c1_i32 : i32
    %68 = arith.extui %67 : i1 to i32
    %c0_i32_24 = arith.constant 0 : i32
    %69 = arith.cmpi ne, %68, %c0_i32_24 : i32
    scf.if %69 {
      %cst_25 = arith.constant dense<0.000000e+00> : vector<8xf32>
      %70 = vector.multi_reduction <add>, %4, %cst_25 [1] : vector<8x16xf32> to vector<8xf32>
      %71 = vector.shape_cast %70 : vector<8xf32> to vector<8x1xf32>
      %c0_26 = arith.constant 0 : index
      %c0_27 = arith.constant 0 : index
      %72 = vector.load %arg12[%c0_26, %c0_27] : memref<8x1xf32, #tpu.memory_space<vmem>>, vector<8x1xf32>
      %73 = arith.mulf %72, %71 : vector<8x1xf32>
      %cst_28 = arith.constant 2.560000e-10 : f32
      %74 = vector.broadcast %cst_28 : f32 to vector<8x1xf32>
      %75 = arith.addf %73, %74 : vector<8x1xf32>
      %cst_29 = arith.constant 1.000000e-24 : f32
      %76 = vector.broadcast %cst_29 : f32 to vector<8x1xf32>
      %77 = arith.maximumf %75, %76 : vector<8x1xf32>
      %78 = math.rsqrt %77 : vector<8x1xf32>
      %c0_30 = arith.constant 0 : index
      %c0_31 = arith.constant 0 : index
      %79 = vector.load %arg11[%c0_30, %c0_31] : memref<8x128xf32, #tpu.memory_space<vmem>>, vector<8x128xf32>
      %80 = vector.broadcast %78 : vector<8x1xf32> to vector<8x128xf32>
      %81 = arith.mulf %79, %80 : vector<8x128xf32>
      %c0_32 = arith.constant 0 : index
      %c0_33 = arith.constant 0 : index
      %82 = vector.load %arg6[%c0_32, %c0_33] : memref<1x128xf32, #tpu.memory_space<vmem>>, vector<1x128xf32>
      %83 = vector.broadcast %82 : vector<1x128xf32> to vector<8x128xf32>
      %84 = arith.addf %81, %83 : vector<8x128xf32>
      %cst_34 = arith.constant 0.000000e+00 : f32
      %85 = vector.broadcast %cst_34 : f32 to vector<8x128xf32>
      %86 = arith.maximumf %84, %85 : vector<8x128xf32>
      %c0_35 = arith.constant 0 : index
      %c0_36 = arith.constant 0 : index
      %87 = vector.load %arg5[%c0_35, %c0_36] : memref<128x128xf32, #tpu.memory_space<vmem>>, vector<128x128xf32>
      %cst_37 = arith.constant dense<0.000000e+00> : vector<8x128xf32>
      %88 = tpu.matmul %86, %87, %cst_37 {dimension_numbers = #tpu.dot_dimension_numbers<[1], [0], [0], [1], [0, 0, 1, 1], [], []>} : vector<8x128xf32>, vector<128x128xf32>, vector<8x128xf32> -> vector<8x128xf32>
      %c0_38 = arith.constant 0 : index
      %c0_39 = arith.constant 0 : index
      %89 = vector.load %arg7[%c0_38, %c0_39] : memref<1x128xf32, #tpu.memory_space<vmem>>, vector<1x128xf32>
      %90 = vector.broadcast %89 : vector<1x128xf32> to vector<8x128xf32>
      %91 = arith.addf %88, %90 : vector<8x128xf32>
      %cst_40 = arith.constant 0.000000e+00 : f32
      %92 = vector.broadcast %cst_40 : f32 to vector<8x128xf32>
      %93 = arith.maximumf %91, %92 : vector<8x128xf32>
      %c0_41 = arith.constant 0 : index
      %c0_42 = arith.constant 0 : index
      %94 = vector.load %arg8[%c0_41, %c0_42] : memref<1x128xf32, #tpu.memory_space<vmem>>, vector<1x128xf32>
      %95 = vector.broadcast %94 : vector<1x128xf32> to vector<8x128xf32>
      %96 = arith.mulf %93, %95 : vector<8x128xf32>
      %cst_43 = arith.constant dense<0.000000e+00> : vector<8xf32>
      %97 = vector.multi_reduction <add>, %96, %cst_43 [1] : vector<8x128xf32> to vector<8xf32>
      %98 = vector.shape_cast %97 : vector<8xf32> to vector<8x1xf32>
      %c0_44 = arith.constant 0 : index
      %c0_45 = arith.constant 0 : index
      %99 = memref.load %arg9[%c0_44, %c0_45] : memref<1x1xf32, #tpu.memory_space<smem>>
      %100 = vector.broadcast %99 : f32 to vector<8x1xf32>
      %101 = arith.addf %98, %100 : vector<8x1xf32>
      %102 = arith.negf %101 : vector<8x1xf32>
      %103 = math.exp %102 : vector<8x1xf32>
      %cst_46 = arith.constant 1.000000e+00 : f32
      %104 = vector.broadcast %cst_46 : f32 to vector<8x1xf32>
      %105 = arith.addf %104, %103 : vector<8x1xf32>
      %106 = arith.divf %104, %105 : vector<8x1xf32>
      %c0_47 = arith.constant 0 : index
      %c0_48 = arith.constant 0 : index
      %107 = vector.load %arg10[%c0_47, %c0_48] : memref<8x1xf32, #tpu.memory_space<vmem>>, vector<8x1xf32>
      tpu.vector_store %arg10[%c0_47, %c0_48], %106 {strides = array<i32>} : memref<8x1xf32, #tpu.memory_space<vmem>>, vector<8x1xf32>,
    } else {
    }
    return
  }
  func.func @transform_0(%arg0: i32, %arg1: i32) -> (i32, i32) {
    %c0_i32 = arith.constant 0 : i32
    %c0_i32_0 = arith.constant 0 : i32
    return %arg0, %c0_i32 : i32, i32
  }
  func.func @transform_1(%arg0: i32, %arg1: i32) -> (i32, i32, i32) {
    %c0_i32 = arith.constant 0 : i32
    %c0_i32_0 = arith.constant 0 : i32
    return %arg1, %arg0, %c0_i32 : i32, i32, i32
  }
  func.func @transform_2(%arg0: i32, %arg1: i32) -> (i32, i32) {
    %c0_i32 = arith.constant 0 : i32
    %c0_i32_0 = arith.constant 0 : i32
    return %arg1, %c0_i32 : i32, i32
  }
  func.func @transform_3(%arg0: i32, %arg1: i32) -> (i32, i32) {
    %c0_i32 = arith.constant 0 : i32
    %c0_i32_0 = arith.constant 0 : i32
    %c0_i32_1 = arith.constant 0 : i32
    return %c0_i32, %c0_i32_0 : i32, i32
  }
  func.func @transform_4(%arg0: i32, %arg1: i32) -> (i32, i32) {
    %c0_i32 = arith.constant 0 : i32
    %c0_i32_0 = arith.constant 0 : i32
    %c0_i32_1 = arith.constant 0 : i32
    return %c0_i32, %c0_i32_0 : i32, i32
  }
  func.func @transform_5(%arg0: i32, %arg1: i32) -> (i32, i32) {
    %c0_i32 = arith.constant 0 : i32
    %c0_i32_0 = arith.constant 0 : i32
    %c0_i32_1 = arith.constant 0 : i32
    return %c0_i32, %c0_i32_0 : i32, i32
  }
  func.func @transform_6(%arg0: i32, %arg1: i32) -> (i32, i32) {
    %c0_i32 = arith.constant 0 : i32
    %c0_i32_0 = arith.constant 0 : i32
    %c0_i32_1 = arith.constant 0 : i32
    return %c0_i32, %c0_i32_0 : i32, i32
  }
  func.func @transform_7(%arg0: i32, %arg1: i32) -> (i32, i32) {
    %c0_i32 = arith.constant 0 : i32
    %c0_i32_0 = arith.constant 0 : i32
    %c0_i32_1 = arith.constant 0 : i32
    return %c0_i32, %c0_i32_0 : i32, i32
  }
  func.func @transform_8(%arg0: i32, %arg1: i32) -> (i32, i32) {
    %c0_i32 = arith.constant 0 : i32
    %c0_i32_0 = arith.constant 0 : i32
    return %arg0, %c0_i32 : i32, i32
  }
}

</mosaic_0001>

<bundles_post_ra>
// kernel: tpu_custom_call.1
= control target key start
LH: loop header
LB: loop body
LE: loop exit
PB: predicated region body
PF: predicated region fallthrough
CT: control target
= control target key end

     0   :  { %s1485_s0 = inlined_call_operand.vmem [shape: f32[16,16], index: 0, kind: input, shape index: {}]   ;;  %s1486_s1 = inlined_call_operand.vmem [shape: f32[2,16,8], index: 1, kind: input, shape index: {}]   ;;  %s1487_s2 = inlined_call_operand.hbm [shape: f32[256,128], index: 2, kind: input, shape index: {}]   ;;  %s1488_s3 = inlined_call_operand.hbm [shape: f32[128,128], index: 3, kind: input, shape index: {}]   ;;  %s1489_s4 = inlined_call_operand.vmem [shape: f32[1,128], index: 4, kind: input, shape index: {}]   ;;  %s1490_s5 = inlined_call_operand.vmem [shape: f32[1,128], index: 5, kind: input, shape index: {}]   ;;  %s1491_s6 = inlined_call_operand.vmem [shape: f32[1,128], index: 6, kind: input, shape index: {}]   ;;  %s1492_s7 = inlined_call_operand.<no memory space> [shape: f32[1,1], index: 7, kind: input, shape index: {}]   ;;  %s1493_s8 = inlined_call_operand.vmem [shape: f32[16,1], index: 8, kind: output, shape index: {}]  }
   0x1   :  { %1498 = sst [smem:[#allocation14_spill]] %s1488_s3 }
   0x2   :  { %13 = sst [smem:[#allocation4]] %s1492_s7 }
   0x3   :  { %14 = vsyncpa [#allocation6], 0 }
   0x4   :  { %16 = vsyncpa [#allocation6 + $0x1], 0 }
   0x5   :  { %17 = vsyncpa [#allocation8], 0  ;;  %s1228_s29 = smov 0   ;;  %s1230_s30 = smov 0  }
   0x6   :  { %s1232_s9 = smov 0   ;;  %s1234_s10 = smov 0  }
   0x7   :  { %s1236_s11 = smov 0   ;;  %s1238_s12 = smov 0  }
   0x8   :  { %s1240_s13 = smov 0   ;;  %s1242_s14 = smov 0  }
   0x9 LB: > { %1499 = sst [smem:[#allocation11_spill]] %s1154_s13  ;;  %s871_s7 = sadd.s32 4294967295, %s1158_s14   ;;  %s1158_s14 = sphi %s1242_s14, %s23_s14   ;;  %s1154_s13 = sphi %s1240_s13, %s1511_s13   ;;  %s1150_s12 = sphi %s1238_s12, %s1516_s12   ;;  %s1146_s11 = sphi %s1236_s11, %s1509_s11   ;;  %s1142_s10 = sphi %s1234_s10, %s1515_s10   ;;  %s1138_s9 = sphi %s1232_s9, %s1514_s9   ;;  %s1134_s30 = sphi %s1230_s30, %s1513_s30   ;;  %s1130_s29 = sphi %s1228_s29, %s1512_s29  }
   0xa   : > { %p109_p0 = scmp.ne.s32.totalorder %s1134_s30, %s1130_s29  ;;  %p1268_p1 = scmp.eq.s32.totalorder %s871_s7, 0 }
   0xb   : > { %p873_p2 = scmp.ge.s32.totalorder %s1158_s14, 1  ;;  %p251_p3 = scmp.lt.s32.totalorder %s1158_s14, 5 }
   0xc   : > { %p1276_p4 = por %p1268_p1, %p109_p0  ;;  %s1502_s3 = sld [smem:[#allocation14_spill]] }
   0xd   : > { %p1283_p5 = pnand %p873_p2, %p251_p3  ;;  %s1160_s21 = smov [#allocation7]  }
   0xe   : > { %s264_s22 = sshll.u32 %s1160_s21, 4  ;;  %s1494_s23 = smov 128   ;;  %s265_s22 = int_to_ptr.vmem [resolvable:$true] %s264_s22 }
   0xf   : > { %p898_p6 = pneg %p1283_p5  ;;  %s1495_s24 = smov 8  }
  0x10   : > { %s32_s25 = sadd.s32 1, %s1150_s12  ;;  %s35_s26 = sadd.s32 1, %s1154_s13 }
  0x11   : > { %p899_p7 = pnand %p898_p6, %p1268_p1  ;;  %p33_p8 = scmp.ge.s32.totalorder %s32_s25, 2 }
  0x12   : > { %s262_s19 = sshll.u32 %s1502_s3, 4  ;;  %s96_s27 = sadd.s32 1, %s1138_s9  ;;  %s263_s19 = int_to_ptr.hbm [resolvable:$true] %s262_s19 }
  0x13   : > { %901 = dma.hbm_to_vmem [thread:$0]  (!%p899_p7), %s263_s19, 2048, %s265_s22, [#allocation8], %s1494_s23, %s1494_s23, %s1495_s24  }
  0x14   : > { %p103_p9 = scmp.ne.s32.totalorder %s1138_s9, %s1134_s30  ;;  %s1518_s25 = smov (%p33_p8, %s32_s25), 0 }
  0x15   : > { %1504 = sst [smem:[#allocation12_spill]] %s1518_s25  ;;  %s1520_s26 = smov (!%p33_p8, %s35_s26), %s1154_s13 }
  0x16   : > { %s93_s28 = ssub.s32 %s1150_s12, %s1518_s25  ;;  %p104_p10 = scmp.eq.s32.totalorder %s1158_s14, 0 }
  0x17   : > { %p37_p11 = scmp.ge.s32.totalorder %s1520_s26, 2  ;;  %p94_p12 = scmp.eq.s32.totalorder %s93_s28, 0 }
  0x18   : > { %p1305_p13 = por %p104_p10, %p103_p9  ;;  %s308_s17 = sand.u32 1, %s1138_s9  }
  0x19   : > { %s1522_s26 = smov (%p37_p11, %s1520_s26), 0  ;;  %s891_s18 = sshll.u32 %s1150_s12, 7 }
  0x1a   : > { %1506 = sst [smem:[#allocation13_spill]] %s1522_s26  ;;  %p907_p0 = scmp.lt.s32.totalorder %s1158_s14, 4 }
  0x1b   : > { %s1312_s7 = scalar_select %p94_p12, %s1138_s9, %s96_s27  }
  0x1c   : > { %s876_s19 = sshll.u32 %s308_s17, 7  ;;  %s317_s23 = scalar_lea.hbm %s1487_s2, %s891_s18 }
  0x1d   : > { %s318_s24 = sshll.u32 %s317_s23, 4  ;;  %s312_s3 = scalar_lea.vmem [#allocation5], %s876_s19  ;;  %s319_s24 = int_to_ptr.hbm [resolvable:$true] %s318_s24 }
  0x1e   : > { %s320_s28 = sshll.u32 %s312_s3, 4  ;;  %p903_p2 = pnand %p907_p0, %p1305_p13  ;;  %s321_s28 = int_to_ptr.vmem [resolvable:$true] %s320_s28 }
  0x1f   : > { %s309_s25 = scalar_lea.sflag [#allocation6], %s308_s17  ;;  %s1507_s13 = smov 8  }
  0x20   : > { %s1508_s26 = smov 128   ;;  %332 = sbr.rel (%p1283_p5) target bundleno = 1001 (0x3e9), region = 52 }
  0x21   : > { %905 = dma.hbm_to_vmem [thread:$0]  (!%p903_p2), %s319_s24, 2048, %s321_s28, %s309_s25, %s1508_s26, %s1508_s26, %s1507_s13  }
  0x22   : > { %s334_s27 = sand.u32 (!%p1283_p5), 1, %s1134_s30  }
  0x23   : > { %s880_s21 = sshll.u32 (!%p1283_p5), %s334_s27, 7  ;;  %s335_s18 = scalar_lea.sflag (!%p1283_p5), [#allocation6], %s334_s27 }
  0x24   : > { %s1328_s23 = scalar_lea.vmem (!%p1283_p5), [#allocation5], %s880_s21 }
  0x25   : > { %1121 = dma.done.wait (%p1276_p4), %s335_s18, 2048  }
  0x26   : > { %1123 = vsyncadd (%p1276_p4), %s335_s18, 4294965248 }
  0x27   : > { %1125 = dma.done.wait (%p1268_p1), [#allocation8], 2048  }
  0x28   : > { %1127 = vsyncadd (%p1268_p1), [#allocation8], 4294965248  ;;  %p388_p3 = scmp.lt.s32.totalorder %s1146_s11, 1  ;;  %p392_p5 = scmp.lt.s32.totalorder %s1142_s10, 1 }
  0x29   : > { %p886_p1 = scmp.ne.s32.totalorder %s1142_s10, 0 }
  0x2a   : > { %s1524_s11 = smov (!%p388_p3, %s1146_s11), 1 }
  0x2b   : > { %s393_s3 = scalar_select %p392_p5, %s1142_s10, 1 }
  0x2c   : > { %s882_s13 = sshll.u32 %s1524_s11, 3  ;;  %408 = sbr.rel (%p886_p1) target bundleno = 52 (0x34), region = 64 }
  0x2d   : > { %s1345_s16 = scalar_lea.vmem %s1485_s0, %s882_s13  ;;  %s883_s25 = sshll.u32 %s393_s3, 1 }
  0x2e   : > { %s397_s26 = sadd.s32 %s883_s25, %s1524_s11  ;;  %s1350_s15 = scalar_lea.vmem %s1493_s8, %s882_s13 }
  0x2f   : > { %s884_s19 = sshll.u32 %s397_s26, 3 }
  0x30   : > { %s399_s27 = scalar_lea.vmem %s1486_s1, %s884_s19 }
  0x31   : > { %vm410_vm0 = vcmask 7168   ;;  %v1163_v0 = vmov 0.0  }
  0x32   : > { %409 = vst [vmem:[#allocation2] sm:$0xff] %v1163_v0 }
  0x33   : > { %411 = vst.msk [vmem:[#allocation3] sm:$0xff] %vm410_vm0, %v1163_v0 }
  0x34 PF: > { %v414_v1 = vld [vmem:[%s399_s27] sm:$0xff]  ;;  %v1164_v2 = vmov 3   ;;  %v1165_v3 = vmov 1   ;;  %v1166_v5 = vmov 5   ;;  %v1167_v6 = vmov 4   ;;  %s1172_s11 = smov 48  }
  0x35   : > { %995 = vset.pattern.permute.xlu1 %v1164_v2  ;;  %993 = vset.pattern.permute.xlu0 %v1165_v3  ;;  %v1356_v4 = vand.u32 2147483647, %v414_v1  ;;  %v1168_v7 = vmov 2   ;;  %v1169_v8 = vmov 6   ;;  %v1170_v9 = vmov 7   ;;  %v412_v12 = vld [vmem:[%s1345_s16] sm:$0xff] }
  0x36   : > { %997 = vset.pattern.permute.xlu2 %v1166_v5  ;;  %v1171_v11 = vmov 0   ;;  %v1367_v13 = vand.u32 2147483647, %v412_v12  ;;  %s1173_s21 = smov 16   ;;  %s1174_s18 = smov 96   ;;  %vm643_vm15 = vcmask 64512  }
  0x37   : > { %472 = vperm.xlu1 %995, %v1356_v4   ;;  %436 = vperm.xlu0 %993, %v1356_v4   ;;  %s1175_s3 = smov 64   ;;  %s1176_s13 = smov 32  }
  0x38   : > { %508 = vperm.xlu2 %997, %v1356_v4   ;;  %s1177_s20 = smov 80   ;;  %s1178_s24 = smov 112  }
  0x39   : > { %p887_p4 = scmp.ne.s32.totalorder %s1142_s10, 1 }
  0x3a   : > { %s732_s17 = sld [smem:[#allocation4]] (!%p887_p4) }
  0x3f   : > { %996 = vset.pattern.permute.xlu1 %v1167_v6  ;;  %994 = vset.pattern.permute.xlu0 %v1168_v7 }
  0x40   : > { %490 = vperm.xlu1 %996, %v1356_v4   ;;  %454 = vperm.xlu0 %994, %v1356_v4  }
  0x41   : > { %998 = vset.pattern.permute.xlu2 %v1169_v8 }
  0x42   : > { %526 = vperm.xlu2 %998, %v1356_v4  }
  0x48   : > { %999 = vset.pattern.permute.xlu1 %v1170_v9  ;;  %1001 = vset.pattern.permute.xlu0 %v1170_v9 }
  0x49   : > { %544 = vperm.xlu1 %999, %v1356_v4  }
  0x4a   : > { %1000 = vset.pattern.permute.xlu2 %v1171_v11 }
  0x4b   : > { %418 = vperm.xlu2 %1000, %v1356_v4  }
  0x92   : > { %v509_v10 = vpop.permute.xlu2 %508 }
  0x93   : > { %v511_v16 = vmul.f32 %v509_v10, %v1367_v13 }
  0x95   : > { %v1374_v18 = vadd.f32 1e-12, %v511_v16 }
  0x97   : > { %vm520_vm11 = vcmp.eq.f32.partialorder %v1374_v18, inf  ;;  %vm522_vm12 = vcmp.eq.f32.partialorder %v1374_v18, 0.0 }
  0x9c   : > { %v527_v14 = vpop.permute.xlu2 %526 }
  0x9d   : > { %v529_v15 = vmul.f32 %v527_v14, %v1367_v13 }
  0x9f   : > { %v1371_v17 = vadd.f32 1e-12, %v529_v15 }
  0xa1   : > { %1002 = vrsqrt.f32 %v1371_v17  ;;  %vm538_vm5 = vcmp.eq.f32.partialorder %v1371_v17, inf  ;;  %v541_v12 = vand.u32 2147483648, %v1371_v17  ;;  %vm540_vm6 = vcmp.eq.f32.partialorder %v1371_v17, 0.0 }
  0xa2   : > { %1004 = vrsqrt.f32 %v1374_v18 }
  0xa7   : > { %v1003_v23 = vpop.eup %1002 }
  0xa8   : > { %v532_v26 = vmul.f32 %v1003_v23, %v1371_v17  ;;  %v1380_v27 = vpop.eup %1004 }
  0xa9   : > { %v473_v19 = vpop.permute.xlu1 %472  ;;  %v437_v20 = vpop.permute.xlu0 %436  ;;  %v514_v34 = vmul.f32 %v1380_v27, %v1374_v18 }
  0xaa   : > { %v475_v21 = vmul.f32 %v473_v19, %v1367_v13  ;;  %v439_v22 = vmul.f32 %v437_v20, %v1367_v13  ;;  %v533_v28 = vmul.f32 %v1003_v23, %v532_v26 }
  0xab   : > { %v515_v44 = vmul.f32 %v1380_v27, %v514_v34 }
  0xac   : > { %v476_v24 = vadd.f32 1e-12, %v475_v21  ;;  %v440_v25 = vadd.f32 1e-12, %v439_v22  ;;  %v534_v39 = vmul.f32 0.5, %v533_v28 }
  0xad   : > { %v516_v53 = vmul.f32 0.5, %v515_v44  ;;  %v617_v44 = vld [vmem:[%s1328_s23 + $0x68] sm:$0xff] }
  0xae   : > { %1006 = vrsqrt.f32 %v476_v24  ;;  %v535_v45 = vsub.f32 1.5, %v534_v39  ;;  %vm484_vm1 = vcmp.eq.f32.partialorder %v476_v24, inf  ;;  %vm486_vm2 = vcmp.eq.f32.partialorder %v476_v24, 0.0 }
  0xaf   : > { %1008 = vrsqrt.f32 %v440_v25  ;;  %v487_v60 = vand.u32 2147483648, %v476_v24  ;;  %vm448_vm3 = vcmp.eq.f32.partialorder %v440_v25, inf  ;;  %vm450_vm4 = vcmp.eq.f32.partialorder %v440_v25, 0.0 }
  0xb0   : > { %v536_v54 = vmul.f32 %v1003_v23, %v535_v45  ;;  %v451_v1 = vand.u32 2147483648, %v440_v25  ;;  %v517_v11 = vsub.f32 1.5, %v516_v53  ;;  %v616_v45 = vld [vmem:[%s1328_s23 + $0x60] sm:$0xff]  ;;  %v611_v53 = vld [vmem:[%s1328_s23 + $0x38] sm:$0xff] }
  0xb2   : > { %v491_v29 = vpop.permute.xlu1 %490  ;;  %v455_v30 = vpop.permute.xlu0 %454  ;;  %v537_v3 = vmul.f32 %v536_v54, %v1371_v17  ;;  %v518_v23 = vmul.f32 %v1380_v27, %v517_v11  ;;  %v610_v54 = vld [vmem:[%s1328_s23 + $0x30] sm:$0xff] }
  0xb3   : > { %v493_v31 = vmul.f32 %v491_v29, %v1367_v13  ;;  %v457_v32 = vmul.f32 %v455_v30, %v1367_v13 }
  0xb4   : > { %v1007_v33 = vpop.eup %1006  ;;  %v539_v15 = vsel %vm538_vm5, %v1371_v17, %v537_v3  ;;  %vm595_vm5 = vcmask 523264  }
  0xb5   : > { %v1009_v35 = vpop.eup %1008  ;;  %v1386_v36 = vadd.f32 1e-12, %v493_v31  ;;  %v1388_v37 = vadd.f32 1e-12, %v457_v32  ;;  %v478_v38 = vmul.f32 %v1007_v33, %v476_v24 }
  0xb6   : > { %v442_v40 = vmul.f32 %v1009_v35, %v440_v25 }
  0xb7   : > { %1010 = vrsqrt.f32 %v1386_v36  ;;  %v479_v41 = vmul.f32 %v1007_v33, %v478_v38  ;;  %vm502_vm7 = vcmp.eq.f32.partialorder %v1386_v36, inf  ;;  %v505_v26 = vand.u32 2147483648, %v1386_v36 }
  0xb8   : > { %1012 = vrsqrt.f32 %v1388_v37  ;;  %v443_v42 = vmul.f32 %v1009_v35, %v442_v40  ;;  %vm466_vm8 = vcmp.eq.f32.partialorder %v1388_v37, inf  ;;  %v469_v17 = vand.u32 2147483648, %v1388_v37 }
  0xb9   : > { %v480_v43 = vmul.f32 0.5, %v479_v41  ;;  %vm504_vm9 = vcmp.eq.f32.partialorder %v1386_v36, 0.0  ;;  %vm468_vm10 = vcmp.eq.f32.partialorder %v1388_v37, 0.0 }
  0xba   : > { %v444_v46 = vmul.f32 0.5, %v443_v42 }
  0xbb   : > { %v545_v47 = vpop.permute.xlu1 %544  ;;  %v481_v48 = vsub.f32 1.5, %v480_v43  ;;  %v618_v43 = vld [vmem:[%s1328_s23 + $0x70] sm:$0xff] }
  0xbc   : > { %v547_v49 = vmul.f32 %v545_v47, %v1367_v13  ;;  %v445_v50 = vsub.f32 1.5, %v444_v46  ;;  %v615_v46 = vld [vmem:[%s1328_s23 + $0x58] sm:$0xff]  ;;  %v614_v47 = vld [vmem:[%s1328_s23 + $0x50] sm:$0xff] }
  0xbd   : > { %v1011_v51 = vpop.eup %1010  ;;  %v482_v52 = vmul.f32 %v1007_v33, %v481_v48  ;;  %v519_v33 = vmul.f32 %v518_v23, %v1374_v18  ;;  %v419_v48 = vpop.permute.xlu2 %418 }
  0xbe   : > { %v1013_v55 = vpop.eup %1012  ;;  %v1394_v56 = vadd.f32 1e-12, %v547_v49  ;;  %v446_v57 = vmul.f32 %v1009_v35, %v445_v50  ;;  %v496_v58 = vmul.f32 %v1011_v51, %v1386_v36  ;;  %v421_v49 = vmul.f32 %v419_v48, %v1367_v13 }
  0xbf   : > { %v483_v59 = vmul.f32 %v482_v52, %v476_v24  ;;  %v460_v61 = vmul.f32 %v1013_v55, %v1388_v37  ;;  %v612_v52 = vld [vmem:[%s1328_s23 + $0x40] sm:$0xff] }
  0xc0   : > { %1014 = vrsqrt.f32 %v1394_v56  ;;  %v447_v62 = vmul.f32 %v446_v57, %v440_v25  ;;  %v497_v63 = vmul.f32 %v1011_v51, %v496_v58  ;;  %vm556_vm13 = vcmp.eq.f32.partialorder %v1394_v56, inf  ;;  %v608_v57 = vld [vmem:[%s1328_s23 + $0x20] sm:$0xff]  ;;  %v607_v58 = vld [vmem:[%s1328_s23 + $0x18] sm:$0xff] }
  0xc1   : > { %v485_v0 = vsel %vm484_vm1, %v476_v24, %v483_v59  ;;  %v461_v2 = vmul.f32 %v1013_v55, %v460_v61  ;;  %v542_v24 = vsel %vm540_vm6, %v541_v12, %v539_v15  ;;  %v559_v39 = vand.u32 2147483648, %v1394_v56  ;;  %v606_v59 = vld [vmem:[%s1328_s23 + $0x10] sm:$0xff]  ;;  %v605_v61 = vld [vmem:[%s1328_s23 + $0x8] sm:$0xff] }
  0xc2   : > { %v488_v5 = vsel %vm486_vm2, %v487_v60, %v485_v0  ;;  %v449_v6 = vsel %vm448_vm3, %v440_v25, %v447_v62  ;;  %v498_v7 = vmul.f32 0.5, %v497_v63  ;;  %vm558_vm14 = vcmp.eq.f32.partialorder %v1394_v56, 0.0  ;;  %v604_v63 = vld [vmem:[%s1328_s23] sm:$0xff] }
  0xc3   : > { %570 = vrot.lane.b32.xlu2 %v488_v5, %s1172_s11  ;;  %v452_v8 = vsel %vm450_vm4, %v451_v1, %v449_v6  ;;  %v462_v9 = vmul.f32 0.5, %v461_v2  ;;  %v422_v50 = vadd.f32 1e-12, %v421_v49  ;;  %v644_v1 = vsel %vm643_vm15, %v1356_v4, 0.0 }
  0xc4   : > { %562 = vrot.lane.b32.xlu0 %v452_v8, %s1173_s21  ;;  %v499_v10 = vsub.f32 1.5, %v498_v7  ;;  %vm589_vm2 = vcmask 130048   ;;  %vm591_vm3 = vcmask 261120   ;;  %vm593_vm4 = vcmask 392192  }
  0xc5   : > { %v463_v14 = vsub.f32 1.5, %v462_v9  ;;  %1016 = vrsqrt.f32 %v422_v50  ;;  %vm430_vm0 = vcmp.eq.f32.partialorder %v422_v50, inf  ;;  %v433_v7 = vand.u32 2147483648, %v422_v50 }
  0xc6   : > { %v1015_v16 = vpop.eup %1014  ;;  %v500_v19 = vmul.f32 %v1011_v51, %v499_v10  ;;  %v613_v51 = vld [vmem:[%s1328_s23 + $0x48] sm:$0xff]  ;;  %vm432_vm1 = vcmp.eq.f32.partialorder %v422_v50, 0.0  ;;  %vm597_vm6 = vcmask 654336  }
  0xc7   : > { %v464_v20 = vmul.f32 %v1013_v55, %v463_v14  ;;  %v550_v21 = vmul.f32 %v1015_v16, %v1394_v56  ;;  %v609_v55 = vld [vmem:[%s1328_s23 + $0x28] sm:$0xff] }
  0xc8   : > { %v501_v22 = vmul.f32 %v500_v19, %v1386_v36 }
  0xc9   : > { %v465_v25 = vmul.f32 %v464_v20, %v1388_v37  ;;  %v551_v28 = vmul.f32 %v1015_v16, %v550_v21 }
  0xca   : > { %v503_v29 = vsel %vm502_vm7, %v1386_v36, %v501_v22  ;;  %v523_v36 = vand.u32 2147483648, %v1374_v18  ;;  %vm599_vm7 = vcmask 785408  }
  0xcb   : > { %v467_v30 = vsel %vm466_vm8, %v1388_v37, %v465_v25  ;;  %v506_v27 = vsel %vm504_vm9, %v505_v26, %v503_v29  ;;  %v552_v31 = vmul.f32 0.5, %v551_v28  ;;  %582 = vrot.lane.b32.xlu2 %v542_v24, %s1174_s18  ;;  %v521_v37 = vsel %vm520_vm11, %v1374_v18, %v519_v33  ;;  %v619_v18 = vld [vmem:[%s1328_s23 + $0x78] sm:$0xff] }
  0xcc   : > { %v470_v32 = vsel %vm468_vm10, %v469_v17, %v467_v30  ;;  %574 = vrot.lane.b32.xlu0 %v506_v27, %s1175_s3  ;;  %v524_v41 = vsel %vm522_vm12, %v523_v36, %v521_v37  ;;  %620 = vmatpush.msra.mxu0 %v619_v18  ;;  %vm601_vm8 = vcmask 916480   ;;  %v642_v25 = vld [vmem:[#allocation3] sm:$0xff]  ;;  %vm648_vm9 = vcmask 7168   ;;  %v603_v17 = vld [vmem:[#allocation2] sm:$0xff] }
  0xcd   : > { %566 = vrot.lane.b32.xlu1 %v470_v32, %s1176_s13  ;;  %v553_v34 = vsub.f32 1.5, %v552_v31 }
  0xce   : > { %621 = vmatpush.msra.mxu0 %v618_v43 }
  0xcf   : > { %v554_v35 = vmul.f32 %v1015_v16, %v553_v34 }
  0xd0   : > { %622 = vmatpush.msra.mxu0 %v617_v44 }
  0xd1   : > { %v555_v38 = vmul.f32 %v554_v35, %v1394_v56 }
  0xd2   : > { %623 = vmatpush.msra.mxu0 %v616_v45 }
  0xd3   : > { %v557_v40 = vsel %vm556_vm13, %v1394_v56, %v555_v38  ;;  %v1017_v56 = vpop.eup %1016 }
  0xd4   : > { %v560_v42 = vsel %vm558_vm14, %v559_v39, %v557_v40  ;;  %624 = vmatpush.msra.mxu0 %v615_v46  ;;  %v424_v60 = vmul.f32 %v1017_v56, %v422_v50 }
  0xd5   : > { %578 = vrot.lane.b32.xlu1 %v524_v41, %s1177_s20  ;;  %586 = vrot.lane.b32.xlu0 %v560_v42, %s1178_s24 }
  0xd6   : > { %625 = vmatpush.msra.mxu0 %v614_v47  ;;  %v425_v62 = vmul.f32 %v1017_v56, %v424_v60 }
  0xd8   : > { %626 = vmatpush.msra.mxu0 %v613_v51  ;;  %v426_v0 = vmul.f32 0.5, %v425_v62 }
  0xda   : > { %627 = vmatpush.msra.mxu0 %v612_v52  ;;  %v427_v2 = vsub.f32 1.5, %v426_v0 }
  0xdc   : > { %628 = vmatpush.msra.mxu0 %v611_v53  ;;  %v428_v3 = vmul.f32 %v1017_v56, %v427_v2 }
  0xde   : > { %629 = vmatpush.msra.mxu0 %v610_v54  ;;  %v429_v6 = vmul.f32 %v428_v3, %v422_v50 }
  0xe0   : > { %630 = vmatpush.msra.mxu0 %v609_v55  ;;  %v431_v8 = vsel %vm430_vm0, %v422_v50, %v429_v6 }
  0xe1   : > { %v434_v10 = vsel %vm432_vm1, %v433_v7, %v431_v8 }
  0xe2   : > { %631 = vmatpush.msra.mxu0 %v608_v57 }
  0xe4   : > { %632 = vmatpush.msra.mxu0 %v607_v58 }
  0xe6   : > { %633 = vmatpush.msra.mxu0 %v606_v59 }
  0xe8   : > { %634 = vmatpush.msra.mxu0 %v605_v61 }
  0xea   : > { %635 = vmatpush.msra.mxu0 %v604_v63 }
  0xff   : > { %645 = vadd.xlane.f32.xlu1 %v644_v1 }
 0x11d   : > { %v571_v12 = vpop.permute.xlu2 %570 }
 0x125   : > { %v583_v21 = vpop.permute.xlu2 %582 }
 0x136   : > { %v563_v5 = vpop.permute.xlu0 %562 }
 0x137   : > { %v590_v14 = vsel %vm589_vm2, %v434_v10, %v563_v5 }
 0x13e   : > { %v575_v9 = vpop.permute.xlu0 %574 }
 0x13f   : > { %v567_v11 = vpop.permute.xlu1 %566 }
 0x140   : > { %v592_v15 = vsel %vm591_vm3, %v590_v14, %v567_v11 }
 0x141   : > { %v594_v4 = vsel %vm593_vm4, %v592_v15, %v571_v12 }
 0x142   : > { %v596_v16 = vsel %vm595_vm5, %v594_v4, %v575_v9 }
 0x147   : > { %v579_v19 = vpop.permute.xlu1 %578  ;;  %v587_v20 = vpop.permute.xlu0 %586 }
 0x148   : > { %v598_v22 = vsel %vm597_vm6, %v596_v16, %v579_v19 }
 0x149   : > { %v600_v23 = vsel %vm599_vm7, %v598_v22, %v583_v21 }
 0x14a   : > { %v602_v24 = vsel %vm601_vm8, %v600_v23, %v587_v20 }
 0x14b   : > { %636 = vmatmul.f32.vlgmr.msra.gmra.mxu0 %v602_v24 }
 0x172   : > { %v646_v26 = vpop.xlane.xlu1 %645 }
 0x173   : > { %v647_v28 = vadd.f32 %v646_v26, %v642_v25 }
 0x175   : > { %649 = vst.msk [vmem:[#allocation3] sm:$0xff] %vm648_vm9, %v647_v28 }
 0x1c7   : > { %653 = sbr.rel (%p887_p4) target bundleno = 1001 (0x3e9), region = 68 }
 0x1c8   : > { %v637_v29 = vpop.f32.mrf.mxu0 }
 0x1c9   : > { %v640_v30 = vadd.f32 %v637_v29, %v603_v17 }
 0x1cb   : > { %641 = vst [vmem:[#allocation2] sm:$0xff] %v640_v30 }
 0x1cc   : > { %v654_v27 = vsel %vm589_vm2, %v1367_v13, 0.0  ;;  %v1179_v31 = vmov 0   ;;  %v699_v32 = vld [vmem:[#allocation7 + $0x78] sm:$0xff]  ;;  %v698_v33 = vld [vmem:[#allocation7 + $0x70] sm:$0xff]  ;;  %v697_v34 = vld [vmem:[#allocation7 + $0x68] sm:$0xff]  ;;  %v733_v7 = vstv %s732_s17 }
 0x1cd   : > { %655 = vadd.xlane.f32.xlu0 %v654_v27  ;;  %704 = vmatpush.msra.mxu0 %v699_v32  ;;  %v696_v35 = vld [vmem:[#allocation7 + $0x60] sm:$0xff]  ;;  %v657_v36 = vld [vmem:[#allocation3] sm:$0xff]  ;;  %v694_v40 = vld [vmem:[#allocation7 + $0x50] sm:$0xff] }
 0x1ce   : > { %1018 = vset.pattern.permute.xlu0 %v1179_v31  ;;  %v695_v37 = vld [vmem:[#allocation7 + $0x58] sm:$0xff]  ;;  %v693_v42 = vld [vmem:[#allocation7 + $0x48] sm:$0xff]  ;;  %v692_v18 = vld [vmem:[#allocation7 + $0x40] sm:$0xff] }
 0x1cf   : > { %705 = vmatpush.msra.mxu0 %v698_v33  ;;  %v691_v43 = vld [vmem:[#allocation7 + $0x38] sm:$0xff]  ;;  %v690_v44 = vld [vmem:[#allocation7 + $0x30] sm:$0xff]  ;;  %v689_v45 = vld [vmem:[#allocation7 + $0x28] sm:$0xff] }
 0x1d0   : > { %v688_v47 = vld [vmem:[#allocation7 + $0x20] sm:$0xff]  ;;  %v687_v49 = vld [vmem:[#allocation7 + $0x18] sm:$0xff]  ;;  %v686_v55 = vld [vmem:[#allocation7 + $0x10] sm:$0xff] }
 0x1d1   : > { %706 = vmatpush.msra.mxu0 %v697_v34  ;;  %v685_v56 = vld [vmem:[#allocation7 + $0x8] sm:$0xff]  ;;  %v684_v57 = vld [vmem:[#allocation7] sm:$0xff]  ;;  %v1019_v59 = vld [vmem:[%s1489_s4] ss:$0 sm:$0xff] }
 0x1d2   : > { %v671_v58 = vld [vmem:[#allocation2] sm:$0xff] }
 0x1d3   : > { %707 = vmatpush.msra.mxu0 %v696_v35  ;;  %v1020_v0 = vld [vmem:[%s1490_s5] ss:$0 sm:$0xff] }
 0x1d4   : > { %v1021_v3 = vld [vmem:[%s1491_s6] ss:$0 sm:$0xff] }
 0x1d5   : > { %708 = vmatpush.msra.mxu0 %v695_v37 }
 0x1d7   : > { %709 = vmatpush.msra.mxu0 %v694_v40 }
 0x1d9   : > { %710 = vmatpush.msra.mxu0 %v693_v42 }
 0x1db   : > { %711 = vmatpush.msra.mxu0 %v692_v18 }
 0x1dd   : > { %712 = vmatpush.msra.mxu0 %v691_v43 }
 0x1df   : > { %713 = vmatpush.msra.mxu0 %v690_v44 }
 0x1e1   : > { %714 = vmatpush.msra.mxu0 %v689_v45 }
 0x1e3   : > { %715 = vmatpush.msra.mxu0 %v688_v47 }
 0x1e5   : > { %716 = vmatpush.msra.mxu0 %v687_v49 }
 0x1e7   : > { %717 = vmatpush.msra.mxu0 %v686_v55 }
 0x1e9   : > { %718 = vmatpush.msra.mxu0 %v685_v56 }
 0x1eb   : > { %719 = vmatpush.msra.mxu0 %v684_v57 }
 0x240   : > { %v656_v38 = vpop.xlane.xlu0 %655 }
 0x241   : > { %v658_v39 = vmul.f32 %v657_v36, %v656_v38 }
 0x243   : > { %v659_v41 = vadd.f32 2.56e-10, %v658_v39 }
 0x245   : > { %v660_v13 = vmax.f32 %v659_v41, 1e-24 }
 0x247   : > { %1022 = vrsqrt.f32 %v660_v13  ;;  %vm667_vm11 = vweird.f32 %v660_v13 }
 0x24d   : > { %v1023_v46 = vpop.eup %1022 }
 0x24e   : > { %v662_v48 = vmul.f32 %v1023_v46, %v660_v13  ;;  %vm668_vm10 = vweird.f32 %v1023_v46 }
 0x24f   : > { %vm669_vm12 = vmor %vm667_vm11, %vm668_vm10 }
 0x250   : > { %v663_v50 = vmul.f32 %v1023_v46, %v662_v48 }
 0x252   : > { %v664_v51 = vmul.f32 0.5, %v663_v50 }
 0x254   : > { %v665_v52 = vsub.f32 1.5, %v664_v51 }
 0x256   : > { %v666_v53 = vmul.f32 %v1023_v46, %v665_v52 }
 0x258   : > { %v670_v54 = vsel %vm669_vm12, %v1023_v46, %v666_v53 }
 0x259   : > { %674 = vperm.xlu0 %1018, %v670_v54  }
 0x2cb   : > { %v675_v60 = vpop.permute.xlu0 %674 }
 0x2cc   : > { %v677_v61 = vmul.f32 %v675_v60, %v671_v58 }
 0x2ce   : > { %v682_v62 = vadd.f32 %v1019_v59, %v677_v61 }
 0x2d0   : > { %v683_v63 = vmax.f32 %v682_v62, 0.0 }
 0x2d2   : > { %720 = vmatmul.f32.vlgmr.msra.gmra.mxu0 %v683_v63 }
 0x34f   : > { %v721_v1 = vpop.f32.mrf.mxu0 }
 0x350   : > { %v722_v2 = vadd.f32 %v1020_v0, %v721_v1 }
 0x352   : > { %v724_v5 = vmax.f32 %v722_v2, 0.0 }
 0x354   : > { %v729_v6 = vmul.f32 %v1021_v3, %v724_v5 }
 0x356   : > { %730 = vadd.xlane.f32.xlu1 %v729_v6 }
 0x3c9   : > { %v731_v8 = vpop.xlane.xlu1 %730 }
 0x3ca   : > { %v734_v9 = vadd.f32 %v733_v7, %v731_v8 }
 0x3cc   : > { %v888_v10 = vmul.f32 -1.442695, %v734_v9 }
 0x3ce   : > { %1024 = vpow2.f32 %v888_v10 }
 0x3d4   : > { %v1025_v11 = vpop.eup %1024 }
 0x3d5   : > { %v738_v12 = vadd.f32 1.0, %v1025_v11 }
 0x3d7   : > { %1026 = vrcp.f32 %v738_v12  ;;  %v750_v16 = vand.u32 2147483648, %v738_v12  ;;  %v748_v20 = vand.u32 2147483647, %v738_v12  ;;  %vm744_vm14 = vweird.f32 %v738_v12 }
 0x3d9   : > { %v751_v22 = vor.u32 1.1754944e-38, %v750_v16  ;;  %vm749_vm0 = vcmp.eq.f32.partialorder %v748_v20, 8.507059e+37 }
 0x3dd   : > { %v1027_v14 = vpop.eup %1026 }
 0x3de   : > { %v740_v15 = vmul.f32 %v1027_v14, %v738_v12  ;;  %vm745_vm13 = vweird.f32 %v1027_v14 }
 0x3df   : > { %vm746_vm15 = vmor %vm744_vm14, %vm745_vm13 }
 0x3e0   : > { %v741_v4 = vsub.f32 1.0, %v740_v15 }
 0x3e2   : > { %v742_v19 = vmul.f32 %v1027_v14, %v741_v4 }
 0x3e4   : > { %v743_v21 = vadd.f32 %v1027_v14, %v742_v19 }
 0x3e6   : > { %v747_v23 = vsel %vm746_vm15, %v1027_v14, %v743_v21 }
 0x3e7   : > { %v752_v24 = vsel %vm749_vm0, %v751_v22, %v747_v23 }
 0x3e8   : > { %754 = vst.msk [vmem:[%s1350_s15] sm:$0xff] %vm648_vm9, %v752_v24 }
 0x3e9 PF: > { %s23_s14 = sadd.s32 1, %s1158_s14   ;;  %s1509_s11 = sld [smem:[#allocation11_spill]] }
 0x3ea   : > { %p20_p6 = scmp.ge.s32.totalorder %s23_s14, 6   ;;  %s1510_s19 = sld [smem:[#allocation12_spill]] }
 0x3eb   : > { %s1511_s13 = sld [smem:[#allocation13_spill]]  ;;  %s1512_s29 = smov %s1134_s30 }
 0x3ec   : > { %s1513_s30 = smov %s1138_s9  ;;  %s1514_s9 = smov %s1312_s7 }
 0x3ed   : > { %s1515_s10 = smov %s1150_s12  ;;  %22 = sbr.rel (!%p20_p6) target bundleno = 9 (0x9), region = 110 }
 0x3f0   : > { %s1516_s12 = smov %s1510_s19 }
 0x3f2   :  { %774 = vsyncpa [#allocation6], 1 }
 0x3f3   :  { %776 = vsyncpa [#allocation6 + $0x1], 1 }
 0x3f4   :  { %777 = vsyncpa [#allocation8], 1 }

</bundles_post_ra>
